<compile_context>
chip_gen: v7x
topology: tpu7x:2x2x1
jax: 0.10.0
libtpu: 0.0.40
codegen_flags: <defaults>
</compile_context>

<pallas_src>
import jax
import jax.numpy as jnp
from jax.experimental import pallas as pl
from jax.experimental.pallas import tpu as pltpu

LANE = 128          # lane width of a vreg
SUBLANE_BF16 = 16   # bf16 packs two rows per sublane -> 16-row granularity


def mlp_kernel(x_ref, w1_ref, b1_ref, w2_ref, b2_ref, w3_ref, b3_ref, o_ref):
    # fc1: bf16 MXU matmul, f32 accumulation; bias + ReLU in f32.
    h1 = jnp.dot(x_ref[...], w1_ref[...], preferred_element_type=jnp.float32)
    h1 = jnp.maximum(h1 + b1_ref[...], 0.0)
    # TODO(synk): dropout1/dropout2 are identity here (eval mode); training-mode
    # stochastic masking would use pltpu.prng_seed + pltpu.prng_random_bits.
    # fc2
    h2 = jnp.dot(h1.astype(w2_ref.dtype), w2_ref[...],
                 preferred_element_type=jnp.float32)
    h2 = jnp.maximum(h2 + b2_ref[...], 0.0)
    # fc3 (logits). Output lanes are zero-padded to 128 via zero weight
    # columns, so this store is lane-dense (unmasked vst).
    o_ref[...] = (jnp.dot(h2.astype(w3_ref.dtype), w3_ref[...],
                          preferred_element_type=jnp.float32) + b3_ref[...])


def _default_tile_b(B, cap=512):
    """Pick a batch tile: divides B, multiple of 16 (bf16 sublane packing)
    unless it spans the whole batch, <= cap rows so double-buffered x/out
    tiles stay well inside scoped VMEM (v7x: 64 MiB physical / 32 MiB default
    scoped), and >= 2 grid steps when possible so v7x's second TensorCore
    gets work on the 'parallel' batch axis."""
    best = B
    for t in range(min(B, cap), 0, -1):
        if B % t == 0 and t % SUBLANE_BF16 == 0:
            best = t
            break
    if best == B and B > SUBLANE_BF16:
        for t in range(min(B // 2, cap), 0, -1):
            if B % t == 0 and t % SUBLANE_BF16 == 0:
                best = t
                break
    return best


def mlp_forward(x, params, *, tile_b=None):
    """x: (B, input_dim) float32. params: f32 dict of w1,b1,w2,b2,w3,b3."""
    B, D = x.shape
    H1 = params["w1"].shape[1]
    H2 = params["w2"].shape[1]
    O = params["w3"].shape[1]
    O_pad = max(LANE, ((O + LANE - 1) // LANE) * LANE)

    if tile_b is None:
        tile_b = _default_tile_b(B)
    assert B % tile_b == 0, f"tile_b={tile_b} must divide batch {B}"
    assert tile_b == B or tile_b % SUBLANE_BF16 == 0, (
        "tile_b must be a multiple of 16 (bf16 sublane packing) unless it "
        "covers the whole batch")

    # bf16 on the MXU/DMA path; biases stay f32 for the f32 epilogue.
    xb = x.astype(jnp.bfloat16)
    w1 = params["w1"].astype(jnp.bfloat16)
    w2 = params["w2"].astype(jnp.bfloat16)
    w3 = jnp.pad(params["w3"].astype(jnp.bfloat16), ((0, 0), (0, O_pad - O)))
    b1 = params["b1"].astype(jnp.float32)
    b2 = params["b2"].astype(jnp.float32)
    b3 = jnp.pad(params["b3"].astype(jnp.float32), ((0, 0), (0, O_pad - O)))

    grid = (B // tile_b,)

    # Grid-invariant weight/bias blocks (full array each step).
    # NOTE(v7x): these params total <32 KiB here, so default double-buffering
    # costs negligible VMEM; with large weights one would single-buffer them
    # via pipeline_mode=pl.Buffered(1) to reclaim headroom for tile_b.
    def full(shape):
        return pl.BlockSpec(shape, lambda i: (0, 0))

    flops = 2 * B * (D * H1 + H1 * H2 + H2 * O_pad)
    bytes_accessed = (xb.size * 2
                      + (w1.size + w2.size + w3.size) * 2
                      + (b1.size + b2.size + b3.size) * 4
                      + B * O_pad * 4)

    # VMEM budget: double-buffered x/out tiles + params, plus generous
    # headroom for f32 intermediates / internal scratch; capped safely under
    # v7x's 64 MiB physical VMEM.
    tile_bytes = tile_b * D * 2 + tile_b * O_pad * 4
    param_bytes = ((w1.size + w2.size + w3.size) * 2
                   + (b1.size + b2.size + b3.size) * 4)
    vmem_limit = min(max(4 * (2 * tile_bytes + 2 * param_bytes),
                         16 * 1024 * 1024),
                     48 * 1024 * 1024)

    out = pl.pallas_call(
        mlp_kernel,
        out_shape=jax.ShapeDtypeStruct((B, O_pad), jnp.float32),
        grid_spec=pltpu.PrefetchScalarGridSpec(
            num_scalar_prefetch=0,
            grid=grid,
            in_specs=[
                pl.BlockSpec((tile_b, D), lambda i: (i, 0)),   # x tile
                full((D, H1)),                                  # w1
                full((1, H1)),                                  # b1
                full((H1, H2)),                                 # w2
                full((1, H2)),                                  # b2
                full((H2, O_pad)),                              # w3 (padded)
                full((1, O_pad)),                               # b3 (padded)
            ],
            out_specs=pl.BlockSpec((tile_b, O_pad), lambda i: (i, 0)),
        ),
        compiler_params=pltpu.CompilerParams(
            dimension_semantics=("parallel",),
            vmem_limit_bytes=int(vmem_limit),
        ),
        cost_estimate=pl.CostEstimate(
            flops=flops, transcendentals=0, bytes_accessed=bytes_accessed),
    )(xb, w1, b1, w2, b2, w3, b3)

    return out[:, :O]   # drop the zero-padded output lanes


def init_params(key, input_dim, hidden_dim1, hidden_dim2, output_dim=3):
    """Deterministic init mimicking nn.Linear's U(-1/sqrt(fan_in), 1/sqrt(fan_in))."""
    ks = jax.random.split(key, 6)

    def linear(kw, kb, fan_in, fan_out):
        bound = 1.0 / jnp.sqrt(fan_in)
        w = jax.random.uniform(kw, (fan_in, fan_out), jnp.float32, -bound, bound)
        b = jax.random.uniform(kb, (1, fan_out), jnp.float32, -bound, bound)
        return w, b

    w1, b1 = linear(ks[0], ks[1], input_dim, hidden_dim1)
    w2, b2 = linear(ks[2], ks[3], hidden_dim1, hidden_dim2)
    w3, b3 = linear(ks[4], ks[5], hidden_dim2, output_dim)
    return {"w1": w1, "b1": b1, "w2": w2, "b2": b2, "w3": w3, "b3": b3}


def reference_forward(x, p):
    """Pure-JAX reference mirroring the kernel's bf16-MXU / f32-epilogue numerics."""
    bf = jnp.bfloat16
    h1 = jnp.dot(x.astype(bf), p["w1"].astype(bf),
                 preferred_element_type=jnp.float32) + p["b1"]
    h1 = jnp.maximum(h1, 0.0)
    h2 = jnp.dot(h1.astype(bf), p["w2"].astype(bf),
                 preferred_element_type=jnp.float32) + p["b2"]
    h2 = jnp.maximum(h2, 0.0)
    return jnp.dot(h2.astype(bf), p["w3"].astype(bf),
                   preferred_element_type=jnp.float32) + p["b3"]


if __name__ == "__main__":
    key = jax.random.PRNGKey(0)
    k_x, k_p = jax.random.split(key)

    # Small shapes consistent with the module: batch=8, flattened input_dim=64,
    # hidden1=32, hidden2=32, output_dim=3.
    B, C, S = 8, 8, 8            # raw input, flattened by x.view(x.size(0), -1)
    input_dim = C * S            # 64
    hidden1, hidden2, out_dim = 32, 32, 3

    x_raw = jax.random.normal(k_x, (B, C, S), dtype=jnp.float32)
    x = x_raw.reshape(B, -1)     # glue: flatten, same as x.view(x.size(0), -1)

    params = init_params(k_p, input_dim, hidden1, hidden2, out_dim)

    out = jax.block_until_ready(mlp_forward(x, params))

    ref = jax.block_until_ready(reference_forward(x, params))
    assert out.shape == (B, out_dim)
    assert jnp.allclose(out, ref, atol=1e-3, rtol=1e-3), float(
        jnp.max(jnp.abs(out - ref)))

    print("KERNEL_OK")
</pallas_src>

<mosaic_0001>
module attributes {stable_mosaic.version = 11 : i64} {
  func.func @mlp_kernel(%arg0: i32, %arg1: memref<8x64xbf16, #tpu.memory_space<vmem>>, %arg2: memref<64x32xbf16, #tpu.memory_space<vmem>>, %arg3: memref<1x32xf32, #tpu.memory_space<vmem>>, %arg4: memref<32x32xbf16, #tpu.memory_space<vmem>>, %arg5: memref<1x32xf32, #tpu.memory_space<vmem>>, %arg6: memref<32x128xbf16, #tpu.memory_space<vmem>>, %arg7: memref<1x128xf32, #tpu.memory_space<vmem>>, %arg8: memref<8x128xf32, #tpu.memory_space<vmem>>) attributes {dimension_semantics = [#tpu.dimension_semantics<parallel>], iteration_bounds = array<i64: 1>, scalar_prefetch = 0 : i64, scratch_operands = 0 : i64, tpu.core_type = #tpu.core_type<tc>, window_params = [{transform_indices = @transform_0, window_bounds = array<i64: 8, 64>}, {pipeline_mode = #tpu.pipeline_mode<synchronous>, transform_indices = @transform_1, window_bounds = array<i64: 64, 32>}, {pipeline_mode = #tpu.pipeline_mode<synchronous>, transform_indices = @transform_2, window_bounds = array<i64: 1, 32>}, {pipeline_mode = #tpu.pipeline_mode<synchronous>, transform_indices = @transform_3, window_bounds = array<i64: 32, 32>}, {pipeline_mode = #tpu.pipeline_mode<synchronous>, transform_indices = @transform_4, window_bounds = array<i64: 1, 32>}, {pipeline_mode = #tpu.pipeline_mode<synchronous>, transform_indices = @transform_5, window_bounds = array<i64: 32, 128>}, {pipeline_mode = #tpu.pipeline_mode<synchronous>, transform_indices = @transform_6, window_bounds = array<i64: 1, 128>}, {transform_indices = @transform_7, window_bounds = array<i64: 8, 128>}]} {
    %c0 = arith.constant 0 : index
    %c0_0 = arith.constant 0 : index
    %0 = vector.load %arg1[%c0, %c0_0] : memref<8x64xbf16, #tpu.memory_space<vmem>>, vector<8x64xbf16>
    %c0_1 = arith.constant 0 : index
    %c0_2 = arith.constant 0 : index
    %1 = vector.load %arg2[%c0_1, %c0_2] : memref<64x32xbf16, #tpu.memory_space<vmem>>, vector<64x32xbf16>
    %cst = arith.constant dense<0.000000e+00> : vector<8x32xf32>
    %2 = tpu.matmul %0, %1, %cst {dimension_numbers = #tpu.dot_dimension_numbers<[1], [0], [0], [1], [0, 0, 1, 1], [], []>} : vector<8x64xbf16>, vector<64x32xbf16>, vector<8x32xf32> -> vector<8x32xf32>
    %c0_3 = arith.constant 0 : index
    %c0_4 = arith.constant 0 : index
    %3 = vector.load %arg3[%c0_3, %c0_4] : memref<1x32xf32, #tpu.memory_space<vmem>>, vector<1x32xf32>
    %4 = vector.broadcast %3 : vector<1x32xf32> to vector<8x32xf32>
    %5 = arith.addf %2, %4 : vector<8x32xf32>
    %cst_5 = arith.constant 0.000000e+00 : f32
    %6 = vector.broadcast %cst_5 : f32 to vector<8x32xf32>
    %7 = arith.maximumf %5, %6 : vector<8x32xf32>
    %8 = arith.truncf %7 : vector<8x32xf32> to vector<8x32xbf16>
    %c0_6 = arith.constant 0 : index
    %c0_7 = arith.constant 0 : index
    %9 = vector.load %arg4[%c0_6, %c0_7] : memref<32x32xbf16, #tpu.memory_space<vmem>>, vector<32x32xbf16>
    %cst_8 = arith.constant dense<0.000000e+00> : vector<8x32xf32>
    %10 = tpu.matmul %8, %9, %cst_8 {dimension_numbers = #tpu.dot_dimension_numbers<[1], [0], [0], [1], [0, 0, 1, 1], [], []>} : vector<8x32xbf16>, vector<32x32xbf16>, vector<8x32xf32> -> vector<8x32xf32>
    %c0_9 = arith.constant 0 : index
    %c0_10 = arith.constant 0 : index
    %11 = vector.load %arg5[%c0_9, %c0_10] : memref<1x32xf32, #tpu.memory_space<vmem>>, vector<1x32xf32>
    %12 = vector.broadcast %11 : vector<1x32xf32> to vector<8x32xf32>
    %13 = arith.addf %10, %12 : vector<8x32xf32>
    %cst_11 = arith.constant 0.000000e+00 : f32
    %14 = vector.broadcast %cst_11 : f32 to vector<8x32xf32>
    %15 = arith.maximumf %13, %14 : vector<8x32xf32>
    %16 = arith.truncf %15 : vector<8x32xf32> to vector<8x32xbf16>
    %c0_12 = arith.constant 0 : index
    %c0_13 = arith.constant 0 : index
    %17 = vector.load %arg6[%c0_12, %c0_13] : memref<32x128xbf16, #tpu.memory_space<vmem>>, vector<32x128xbf16>
    %cst_14 = arith.constant dense<0.000000e+00> : vector<8x128xf32>
    %18 = tpu.matmul %16, %17, %cst_14 {dimension_numbers = #tpu.dot_dimension_numbers<[1], [0], [0], [1], [0, 0, 1, 1], [], []>} : vector<8x32xbf16>, vector<32x128xbf16>, vector<8x128xf32> -> vector<8x128xf32>
    %c0_15 = arith.constant 0 : index
    %c0_16 = arith.constant 0 : index
    %19 = vector.load %arg7[%c0_15, %c0_16] : memref<1x128xf32, #tpu.memory_space<vmem>>, vector<1x128xf32>
    %20 = vector.broadcast %19 : vector<1x128xf32> to vector<8x128xf32>
    %21 = arith.addf %18, %20 : vector<8x128xf32>
    %c0_17 = arith.constant 0 : index
    %c0_18 = arith.constant 0 : index
    %22 = vector.load %arg8[%c0_17, %c0_18] : memref<8x128xf32, #tpu.memory_space<vmem>>, vector<8x128xf32>
    tpu.vector_store %arg8[%c0_17, %c0_18], %21 {strides = array<i32>} : memref<8x128xf32, #tpu.memory_space<vmem>>, vector<8x128xf32>,
    return
  }
  func.func @transform_0(%arg0: i32) -> (i32, i32) {
    %c0_i32 = arith.constant 0 : i32
    %c0_i32_0 = arith.constant 0 : i32
    return %arg0, %c0_i32 : i32, i32
  }
  func.func @transform_1(%arg0: i32) -> (i32, i32) {
    %c0_i32 = arith.constant 0 : i32
    %c0_i32_0 = arith.constant 0 : i32
    %c0_i32_1 = arith.constant 0 : i32
    return %c0_i32, %c0_i32_0 : i32, i32
  }
  func.func @transform_2(%arg0: i32) -> (i32, i32) {
    %c0_i32 = arith.constant 0 : i32
    %c0_i32_0 = arith.constant 0 : i32
    %c0_i32_1 = arith.constant 0 : i32
    return %c0_i32, %c0_i32_0 : i32, i32
  }
  func.func @transform_3(%arg0: i32) -> (i32, i32) {
    %c0_i32 = arith.constant 0 : i32
    %c0_i32_0 = arith.constant 0 : i32
    %c0_i32_1 = arith.constant 0 : i32
    return %c0_i32, %c0_i32_0 : i32, i32
  }
  func.func @transform_4(%arg0: i32) -> (i32, i32) {
    %c0_i32 = arith.constant 0 : i32
    %c0_i32_0 = arith.constant 0 : i32
    %c0_i32_1 = arith.constant 0 : i32
    return %c0_i32, %c0_i32_0 : i32, i32
  }
  func.func @transform_5(%arg0: i32) -> (i32, i32) {
    %c0_i32 = arith.constant 0 : i32
    %c0_i32_0 = arith.constant 0 : i32
    %c0_i32_1 = arith.constant 0 : i32
    return %c0_i32, %c0_i32_0 : i32, i32
  }
  func.func @transform_6(%arg0: i32) -> (i32, i32) {
    %c0_i32 = arith.constant 0 : i32
    %c0_i32_0 = arith.constant 0 : i32
    %c0_i32_1 = arith.constant 0 : i32
    return %c0_i32, %c0_i32_0 : i32, i32
  }
  func.func @transform_7(%arg0: i32) -> (i32, i32) {
    %c0_i32 = arith.constant 0 : i32
    %c0_i32_0 = arith.constant 0 : i32
    return %arg0, %c0_i32 : i32, i32
  }
}

</mosaic_0001>

<bundles_post_ra>
// kernel: tpu_custom_call.1
= control target key start
LH: loop header
LB: loop body
LE: loop exit
PB: predicated region body
PF: predicated region fallthrough
CT: control target
= control target key end

     0   :  { %v352_v1 = vmov 0.0   ;;  %vm353_vm0 = vmmov 0   ;;  %s448_s0 = inlined_call_operand.vmem [shape: bf16[8,64], index: 0, kind: input, shape index: {}]   ;;  %s449_s1 = inlined_call_operand.vmem [shape: bf16[64,32], index: 1, kind: input, shape index: {}]   ;;  %s450_s2 = inlined_call_operand.vmem [shape: f32[1,32], index: 2, kind: input, shape index: {}]   ;;  %s451_s3 = inlined_call_operand.vmem [shape: bf16[32,32], index: 3, kind: input, shape index: {}]   ;;  %s452_s4 = inlined_call_operand.vmem [shape: f32[1,32], index: 4, kind: input, shape index: {}]   ;;  %s453_s5 = inlined_call_operand.vmem [shape: bf16[32,128], index: 5, kind: input, shape index: {}]   ;;  %s454_s6 = inlined_call_operand.vmem [shape: f32[1,128], index: 6, kind: input, shape index: {}]   ;;  %s455_s7 = inlined_call_operand.hbm [shape: f32[8,128], index: 7, kind: output, shape index: {}]  }
   0x1   :  { %v320_v0 = vld [vmem:[%s449_s1] sm:$0xff]   ;;  %289 = vmatprep.subr.bf16.mxu0 %v352_v1  ;;  %301 = vmatprep.subr.bf16.mxu1 %v352_v1  ;;  %v321_v2 = vld [vmem:[%s449_s1 + $0x8] sm:$0xff]   ;;  %v322_v3 = vld [vmem:[%s449_s1 + $0x10] sm:$0xff]  }
   0x2   :  { %290 = vmatpush3.bf16.msra.mxu0 %v320_v0  ;;  %297 = vmatprep.mubr.msk.bf16.mxu0 %vm353_vm0, %v352_v1 }
   0x3   :  { %291 = vmatprep.subr.bf16.mxu0 %v352_v1  ;;  %305 = vmatprep.mubr.msk.bf16.mxu1 %vm353_vm0, %v352_v1 }
   0x6   :  { %292 = vmatpush3.bf16.msra.mxu0 %v321_v2 }
   0x7   :  { %293 = vmatprep.subr.bf16.mxu0 %v352_v1 }
   0x8   :  { %12 = vsyncpa [#allocation3], 0  ;;  %v323_v4 = vld [vmem:[%s449_s1 + $0x18] sm:$0xff]   ;;  %v28_v5 = vld [vmem:[%s448_s0] sm:$0xf]  ;;  %vm68_vm1 = vcmask 523264  }
   0x9   :  { %v324_v6 = vld [vmem:[%s451_s3] sm:$0xff]   ;;  %v325_v7 = vld [vmem:[%s451_s3 + $0x8] sm:$0xff]   ;;  %vm137_vm2 = vcmask 261120   ;;  %s354_s21 = smov [#allocation2]  }
   0xa   :  { %294 = vmatpush3.bf16.msra.mxu0 %v322_v3  ;;  %302 = vmatpush3.bf16.msra.mxu1 %v324_v6  ;;  %v264_v8 = vld [vmem:[%s450_s2] ss:$0 sm:$0xff]  ;;  %v327_v17 = vld [vmem:[%s453_s5 + $0x8] sm:$0xff]  }
   0xb   :  { %295 = vmatprep.subr.bf16.mxu0 %v352_v1  ;;  %303 = vmatprep.subr.bf16.mxu1 %v352_v1  ;;  %v326_v15 = vld [vmem:[%s453_s5] sm:$0xff]   ;;  %s256_s5 = sshll.u32 %s354_s21, 4  ;;  %s257_s5 = int_to_ptr.vmem [resolvable:$true] %s256_s5 }
   0xc   :  { %v270_v18 = vld [vmem:[%s452_s4] ss:$0 sm:$0xff]  ;;  %s328_s4 = scalar_lea.vmem %s257_s5, 128  ;;  %p333_p1 = scmp.lt.s32.totalorder %s257_s5, %s257_s5 }
   0xd   :  { %v274_v26 = vld [vmem:[%s454_s6] ss:$0 sm:$0xff]  ;;  %p329_p0 = scmp.ne.s32.totalorder %s257_s5, %s328_s4  ;;  %p334_p2 = scmp.lt.s32.totalorder %s328_s4, %s328_s4 }
   0xe   :  { %296 = vmatpush3.bf16.msra.mxu0 %v323_v4  ;;  %304 = vmatpush3.bf16.msra.mxu1 %v325_v7 }
   0xf   :  { %309 = vmatprep.subr.bf16.mxu1 %v352_v1  ;;  %p335_p3 = por %p334_p2, %p333_p1 }
  0x11   :  { %298 = vmatmul.mubr.msk.bf16.vlgmr.msra.gmra.mrb[0].mxu0 %vm68_vm1, %v28_v5  ;;  %p336_p4 = pnand %p335_p3, %p329_p0 }
  0xe4   :  { %v106_v9 = vpop.f32.mrb[0].mxu0 }
  0xe5   :  { %v107_v10 = vadd.f32 %v264_v8, %v106_v9  ;;  %v299_v11 = vpop.f32.mrb[1].mxu0 }
  0xe6   :  { %v109_v12 = vpop.f32.mrb[2].mxu0 }
  0xe7   :  { %v112_v13 = vmax.f32 %v107_v10, 0.0  ;;  %v300_v14 = vpop.f32.mrb[3].mxu0 }
  0xe9   :  { %v113_v16 = vpack.c.bf16 %v112_v13, %v112_v13 }
  0xeb   :  { %306 = vmatmul.mubr.msk.bf16.vlgmr.msra.gmra.mrb[0].mxu1 %vm137_vm2, %v113_v16 }
  0xec   :  { %310 = vmatpush3.bf16.msra.mxu1 %v326_v15  ;;  %313 = vmatprep.mubr.msk.bf16.mxu1 %vm353_vm0, %v352_v1 }
  0xed   :  { %311 = vmatprep.subr.bf16.mxu1 %v352_v1 }
  0xf0   :  { %312 = vmatpush3.bf16.msra.mxu1 %v327_v17 }
 0x1be   :  { %v175_v19 = vpop.f32.mrb[0].mxu1 }
 0x1bf   :  { %v176_v20 = vadd.f32 %v270_v18, %v175_v19  ;;  %v307_v21 = vpop.f32.mrb[1].mxu1 }
 0x1c0   :  { %v178_v22 = vpop.f32.mrb[2].mxu1 }
 0x1c1   :  { %v181_v23 = vmax.f32 %v176_v20, 0.0  ;;  %v308_v24 = vpop.f32.mrb[3].mxu1 }
 0x1c3   :  { %v182_v25 = vpack.c.bf16 %v181_v23, %v181_v23 }
 0x1c5   :  { %314 = vmatmul.mubr.msk.bf16.vlgmr.msra.gmra.mrb[4].mxu1 %vm137_vm2, %v182_v25 }
 0x298   :  { %v243_v27 = vpop.f32.mrb[4].mxu1 }
 0x299   :  { %v244_v28 = vadd.f32 %v274_v26, %v243_v27  ;;  %v315_v29 = vpop.f32.mrb[5].mxu1 }
 0x29a   :  { %v246_v30 = vpop.f32.mrb[6].mxu1 }
 0x29b   :  { %249 = vst [vmem:[#allocation2] sm:$0xff] %v244_v28  ;;  %v316_v31 = vpop.f32.mrb[7].mxu1 }
 0x29c   :  { %339 = shalt.err (!%p336_p4)
}
 0x29d   :  { %s340_s6 = scalar_lea.hbm %s455_s7, 128 }
 0x29e   :  { %p341_p5 = scmp.ne.s32.totalorder %s455_s7, %s340_s6  ;;  %p344_p6 = scmp.lt.u32.totalorder %s340_s6, %s455_s7 }
 0x2a0   :  { %p346_p7 = pnand %p344_p6, %p341_p5 }
 0x2a2   :  { %349 = shalt.err (!%p346_p7)
}
 0x2a3   :  { %259 = dma.vmem_to_hbm [thread:$0]  %s257_s5, 128, %s455_s7, [#allocation3]  }
 0x2a4   :  { %350 = dma.done.wait [#allocation3], 128  }
 0x2a5   :  { %351 = vsyncadd [#allocation3], 4294967168 }
 0x2a6   :  { %263 = vsyncpa [#allocation3], 1 }

</bundles_post_ra>
